<compile_context>
chip_gen: v6e
topology: v6e:2x2x1
jax: 0.10.0
libtpu: 0.0.40
codegen_flags: <defaults>
</compile_context>

<pallas_src>
import functools

import jax
import jax.numpy as jnp
from jax import lax
from jax.experimental import pallas as pl
from jax.experimental.pallas import tpu as pltpu

MAX_LEN = 100
SOS = 2        # Vocabulary.SOS
_UNROLL = 4    # manual unroll factor of the decode loop


# ----------------------------------------------------------------------------
# Pallas kernel: whole greedy decode loop in one invocation.
# ----------------------------------------------------------------------------
def _decoder_kernel(ew_ref, whh_ref, bhn_ref, lw_ref, lb_ref, h0_ref,
                    logits_ref, hout_ref):
    max_len = logits_ref.shape[0]

    EW = ew_ref[...]      # (V, 3H)  emb @ [W_ir|W_iz|W_in] + folded biases
    Whh = whh_ref[...]    # (H, 3H)  [W_hr|W_hz|W_hn]
    bhn = bhn_ref[...]    # (1, H)   b_hn (must stay inside the r*(...) term)
    LW = lw_ref[...]      # (H, V)
    lb = lb_ref[...]      # (1, V)

    h0 = h0_ref[...]      # (B, H)
    B, H = h0.shape
    V = EW.shape[0]

    # Hoisted loop invariants: lane-index iota and the initial SOS one-hot row.
    col = lax.broadcasted_iota(jnp.int32, (B, V), 1)
    tok0 = jnp.where(col == SOS, 1.0, 0.0).astype(jnp.float32)

    def one_step(step, h, tok):
        # Two fused gate matmuls (6 -> 2); gh is independent of the argmax
        # chain so it overlaps with the token feedback path on the MXU.
        gi = jnp.dot(tok, EW, preferred_element_type=jnp.float32)   # (B, 3H)
        gh = jnp.dot(h, Whh, preferred_element_type=jnp.float32)    # (B, 3H)

        # r and z in one sigmoid pass; all their biases already live in EW.
        rz = jax.nn.sigmoid(gi[:, :2 * H] + gh[:, :2 * H])          # (B, 2H)
        r = rz[:, :H]
        z = rz[:, H:]
        n = jnp.tanh(gi[:, 2 * H:] + r * (gh[:, 2 * H:] + bhn))
        h_new = (1.0 - z) * n + z * h                                # (B, H)

        # Output projection + resident logits write (bulk HBM writeback at end).
        logits = jnp.dot(h_new, LW, preferred_element_type=jnp.float32) + lb
        logits_ref[pl.ds(step, 1)] = logits[None].astype(logits_ref.dtype)

        # Greedy argmax (first max index, like topk(1)) -> next one-hot input.
        m = jnp.max(logits, axis=-1, keepdims=True)
        cand = jnp.where(logits == m, col, V)
        idx = jnp.min(cand, axis=-1, keepdims=True)                  # (B, 1)
        tok_new = jnp.where(col == idx, 1.0, 0.0).astype(jnp.float32)
        return h_new, tok_new

    n_outer = max_len // _UNROLL
    rem = max_len - n_outer * _UNROLL

    def outer(o, carry):
        h, tok = carry
        base = pl.multiple_of(o * _UNROLL, _UNROLL)
        for u in range(_UNROLL):            # manual unroll (LLO visibility)
            h, tok = one_step(base + u, h, tok)
        return (h, tok)

    h, tok = lax.fori_loop(0, n_outer, outer, (h0, tok0))
    for u in range(rem):                    # static remainder, traced inline
        h, tok = one_step(n_outer * _UNROLL + u, h, tok)

    hout_ref[...] = h   # single final-hidden store, outside the loop

    # TODO(synk): teacher-forcing branch (target_tensor is not None) not wired
    # into the kernel; only the greedy (target_tensor=None) path is implemented.


# ----------------------------------------------------------------------------
# Wrapper: Decoder.forward(encoder_outputs, encoder_hidden, target_tensor=None)
# ----------------------------------------------------------------------------
@functools.partial(jax.jit, static_argnames=("max_len",))
def decoder_forward(params, encoder_outputs, encoder_hidden, max_len=MAX_LEN):
    emb, wih, whh, bih, bhh, lw, lb = params
    V, H = emb.shape
    B = encoder_hidden.shape[1]
    h0 = encoder_hidden[0]  # (B, H)

    # Fuse gate weights along the output axis, gate order [r | z | n].
    wih_all = jnp.concatenate([wih[0], wih[1], wih[2]], axis=1)   # (H, 3H)
    whh_all = jnp.concatenate([whh[0], whh[1], whh[2]], axis=1)   # (H, 3H)

    # Fold embedding into W_ih: onehot @ (emb @ Wih) == (onehot @ emb) @ Wih.
    # Fold biases too: the greedy input is an exact one-hot (rows sum to 1),
    # so adding a bias row to every row of EW reproduces "+ bias" after row
    # selection.  r/z take (b_ir+b_hr, b_iz+b_hz); n takes b_in only — b_hn
    # must stay inside the r*(...) term and is passed separately.
    bias_fold = jnp.concatenate([bih[0] + bhh[0], bih[1] + bhh[1], bih[2]],
                                axis=1)                           # (1, 3H)
    ew = jnp.dot(emb, wih_all) + bias_fold                        # (V, 3H)
    bhn = bhh[2]                                                  # (1, H)

    vmem = pl.BlockSpec(memory_space=pltpu.MemorySpace.VMEM)

    logits, h_final = pl.pallas_call(
        _decoder_kernel,
        out_shape=(
            jax.ShapeDtypeStruct((max_len, B, V), jnp.float32),
            jax.ShapeDtypeStruct((B, H), jnp.float32),
        ),
        in_specs=[vmem] * 6,     # tiny, loop-invariant tensors: whole-array VMEM
        out_specs=(vmem, vmem),  # resident outputs, single writeback at kernel end
    )(ew, whh_all, bhn, lw, lb, h0)

    return logits, h_final[None]  # (MAX_LEN, B, V), (1, B, H)


# ----------------------------------------------------------------------------
# Pure-JAX reference (same math, lax.scan) for correctness checking.
# ----------------------------------------------------------------------------
def decoder_forward_ref(params, encoder_hidden, max_len=MAX_LEN):
    emb, wih, whh, bih, bhh, lw, lb = params
    B = encoder_hidden.shape[1]
    h0 = encoder_hidden[0]
    tok0 = jnp.full((B,), SOS, dtype=jnp.int32)

    def step(carry, _):
        h, tok = carry
        x = emb[tok]
        gi_r = x @ wih[0] + bih[0]
        gi_z = x @ wih[1] + bih[1]
        gi_n = x @ wih[2] + bih[2]
        gh_r = h @ whh[0] + bhh[0]
        gh_z = h @ whh[1] + bhh[1]
        gh_n = h @ whh[2] + bhh[2]
        r = jax.nn.sigmoid(gi_r + gh_r)
        z = jax.nn.sigmoid(gi_z + gh_z)
        n = jnp.tanh(gi_n + r * gh_n)
        h_new = (1.0 - z) * n + z * h
        logits = h_new @ lw + lb
        nxt = jnp.argmax(logits, axis=-1).astype(jnp.int32)
        return (h_new, nxt), logits

    (h_f, _), outs = lax.scan(step, (h0, tok0), None, length=max_len)
    return outs, h_f[None]


def init_params(key, hidden_size, output_size):
    ks = jax.random.split(key, 7)
    s = 1.0 / jnp.sqrt(hidden_size)
    emb = jax.random.normal(ks[0], (output_size, hidden_size), jnp.float32)
    wih = jax.random.uniform(ks[1], (3, hidden_size, hidden_size), jnp.float32, -s, s)
    whh = jax.random.uniform(ks[2], (3, hidden_size, hidden_size), jnp.float32, -s, s)
    bih = jax.random.uniform(ks[3], (3, 1, hidden_size), jnp.float32, -s, s)
    bhh = jax.random.uniform(ks[4], (3, 1, hidden_size), jnp.float32, -s, s)
    lw = jax.random.uniform(ks[5], (hidden_size, output_size), jnp.float32, -s, s)
    lb = jax.random.uniform(ks[6], (1, output_size), jnp.float32, -s, s)
    return (emb, wih, whh, bih, bhh, lw, lb)


if __name__ == "__main__":
    key = jax.random.PRNGKey(0)
    hidden_size = 32     # H
    output_size = 32     # vocabulary size V
    batch = 2            # B
    enc_len = 8          # encoder sequence length (encoder_outputs unused)

    kp, ko, kh = jax.random.split(key, 3)
    params = init_params(kp, hidden_size, output_size)
    encoder_outputs = jax.random.normal(ko, (enc_len, batch, hidden_size), jnp.float32)
    encoder_hidden = jax.random.normal(kh, (1, batch, hidden_size), jnp.float32)

    logits, h_final = decoder_forward(params, encoder_outputs, encoder_hidden,
                                      max_len=MAX_LEN)
    logits = jax.block_until_ready(logits)
    h_final = jax.block_until_ready(h_final)

    ref_logits, ref_h = decoder_forward_ref(params, encoder_hidden, MAX_LEN)
    assert logits.shape == (MAX_LEN, batch, output_size)
    assert h_final.shape == (1, batch, hidden_size)
    assert jnp.allclose(logits, ref_logits, atol=1e-3, rtol=1e-3)
    assert jnp.allclose(h_final, ref_h, atol=1e-3, rtol=1e-3)

    print("KERNEL_OK")
</pallas_src>

<mosaic_0001>
module attributes {stable_mosaic.version = 11 : i64} {
  func.func @_decoder_kernel(%arg0: memref<32x96xf32, #tpu.memory_space<vmem>>, %arg1: memref<32x96xf32, #tpu.memory_space<vmem>>, %arg2: memref<1x32xf32, #tpu.memory_space<vmem>>, %arg3: memref<32x32xf32, #tpu.memory_space<vmem>>, %arg4: memref<1x32xf32, #tpu.memory_space<vmem>>, %arg5: memref<2x32xf32, #tpu.memory_space<vmem>>, %arg6: memref<100x2x32xf32, #tpu.memory_space<vmem>>, %arg7: memref<2x32xf32, #tpu.memory_space<vmem>>) attributes {dimension_semantics = [], scalar_prefetch = 0 : i64, scratch_operands = 0 : i64, tpu.core_type = #tpu.core_type<tc>} {
    %c0 = arith.constant 0 : index
    %c0_0 = arith.constant 0 : index
    %0 = vector.load %arg0[%c0, %c0_0] : memref<32x96xf32, #tpu.memory_space<vmem>>, vector<32x96xf32>
    %c0_1 = arith.constant 0 : index
    %c0_2 = arith.constant 0 : index
    %1 = vector.load %arg1[%c0_1, %c0_2] : memref<32x96xf32, #tpu.memory_space<vmem>>, vector<32x96xf32>
    %c0_3 = arith.constant 0 : index
    %c0_4 = arith.constant 0 : index
    %2 = vector.load %arg2[%c0_3, %c0_4] : memref<1x32xf32, #tpu.memory_space<vmem>>, vector<1x32xf32>
    %c0_5 = arith.constant 0 : index
    %c0_6 = arith.constant 0 : index
    %3 = vector.load %arg3[%c0_5, %c0_6] : memref<32x32xf32, #tpu.memory_space<vmem>>, vector<32x32xf32>
    %c0_7 = arith.constant 0 : index
    %c0_8 = arith.constant 0 : index
    %4 = vector.load %arg4[%c0_7, %c0_8] : memref<1x32xf32, #tpu.memory_space<vmem>>, vector<1x32xf32>
    %c0_9 = arith.constant 0 : index
    %c0_10 = arith.constant 0 : index
    %5 = vector.load %arg5[%c0_9, %c0_10] : memref<2x32xf32, #tpu.memory_space<vmem>>, vector<2x32xf32>
    %6 = tpu.iota {dimensions = array<i32: 1>} : vector<2x32xi32>
    %c2_i32 = arith.constant 2 : i32
    %7 = vector.broadcast %c2_i32 : i32 to vector<2x32xi32>
    %8 = arith.cmpi eq, %6, %7 : vector<2x32xi32>
    %cst = arith.constant 1.000000e+00 : f32
    %cst_11 = arith.constant 0.000000e+00 : f32
    %9 = vector.broadcast %cst : f32 to vector<2x32xf32>
    %10 = vector.broadcast %cst_11 : f32 to vector<2x32xf32>
    %11 = arith.select %8, %9, %10 : vector<2x32xi1>, vector<2x32xf32>
    %c0_i32 = arith.constant 0 : i32
    %c25_i32 = arith.constant 25 : i32
    %12 = arith.addi %c0_i32, %c25_i32 : i32
    %c1_i32 = arith.constant 1 : i32
    %13:2 = scf.for %arg8 = %c0_i32 to %12 step %c1_i32 iter_args(%arg9 = %5, %arg10 = %11) -> (vector<2x32xf32>, vector<2x32xf32>)  : i32 {
      %c4_i32 = arith.constant 4 : i32
      %15 = arith.muli %arg8, %c4_i32 : i32
      %16 = tpu.assume_multiple %15, 4 : i32
      %c0_i32_15 = arith.constant 0 : i32
      %17 = arith.addi %16, %c0_i32_15 : i32
      %cst_16 = arith.constant dense<0.000000e+00> : vector<2x96xf32>
      %18 = tpu.matmul %arg10, %0, %cst_16 {dimension_numbers = #tpu.dot_dimension_numbers<[1], [0], [0], [1], [0, 0, 1, 1], [], []>} : vector<2x32xf32>, vector<32x96xf32>, vector<2x96xf32> -> vector<2x96xf32>
      %cst_17 = arith.constant dense<0.000000e+00> : vector<2x96xf32>
      %19 = tpu.matmul %arg9, %1, %cst_17 {dimension_numbers = #tpu.dot_dimension_numbers<[1], [0], [0], [1], [0, 0, 1, 1], [], []>} : vector<2x32xf32>, vector<32x96xf32>, vector<2x96xf32> -> vector<2x96xf32>
      %20 = vector.extract_strided_slice %18 {offsets = [0, 0], sizes = [2, 64], strides = [1, 1]} : vector<2x96xf32> to vector<2x64xf32>
      %21 = vector.extract_strided_slice %19 {offsets = [0, 0], sizes = [2, 64], strides = [1, 1]} : vector<2x96xf32> to vector<2x64xf32>
      %22 = arith.addf %20, %21 : vector<2x64xf32>
      %23 = arith.negf %22 : vector<2x64xf32>
      %24 = math.exp %23 : vector<2x64xf32>
      %cst_18 = arith.constant 1.000000e+00 : f32
      %25 = vector.broadcast %cst_18 : f32 to vector<2x64xf32>
      %26 = arith.addf %25, %24 : vector<2x64xf32>
      %27 = arith.divf %25, %26 : vector<2x64xf32>
      %28 = vector.extract_strided_slice %27 {offsets = [0, 0], sizes = [2, 32], strides = [1, 1]} : vector<2x64xf32> to vector<2x32xf32>
      %29 = vector.extract_strided_slice %27 {offsets = [0, 32], sizes = [2, 32], strides = [1, 1]} : vector<2x64xf32> to vector<2x32xf32>
      %30 = vector.extract_strided_slice %18 {offsets = [0, 64], sizes = [2, 32], strides = [1, 1]} : vector<2x96xf32> to vector<2x32xf32>
      %31 = vector.extract_strided_slice %19 {offsets = [0, 64], sizes = [2, 32], strides = [1, 1]} : vector<2x96xf32> to vector<2x32xf32>
      %32 = vector.broadcast %2 : vector<1x32xf32> to vector<2x32xf32>
      %33 = arith.addf %31, %32 : vector<2x32xf32>
      %34 = arith.mulf %28, %33 : vector<2x32xf32>
      %35 = arith.addf %30, %34 : vector<2x32xf32>
      %36 = math.tanh %35 : vector<2x32xf32>
      %cst_19 = arith.constant 1.000000e+00 : f32
      %37 = vector.broadcast %cst_19 : f32 to vector<2x32xf32>
      %38 = arith.subf %37, %29 : vector<2x32xf32>
      %39 = arith.mulf %38, %36 : vector<2x32xf32>
      %40 = arith.mulf %29, %arg9 : vector<2x32xf32>
      %41 = arith.addf %39, %40 : vector<2x32xf32>
      %cst_20 = arith.constant dense<0.000000e+00> : vector<2x32xf32>
      %42 = tpu.matmul %41, %3, %cst_20 {dimension_numbers = #tpu.dot_dimension_numbers<[1], [0], [0], [1], [0, 0, 1, 1], [], []>} : vector<2x32xf32>, vector<32x32xf32>, vector<2x32xf32> -> vector<2x32xf32>
      %43 = vector.broadcast %4 : vector<1x32xf32> to vector<2x32xf32>
      %44 = arith.addf %42, %43 : vector<2x32xf32>
      %45 = vector.shape_cast %44 : vector<2x32xf32> to vector<1x2x32xf32>
      %46 = arith.index_cast %17 : i32 to index
      %c0_21 = arith.constant 0 : index
      %c0_22 = arith.constant 0 : index
      %47 = vector.load %arg6[%46, %c0_21, %c0_22] : memref<100x2x32xf32, #tpu.memory_space<vmem>>, vector<1x2x32xf32>
      tpu.vector_store %arg6[%46, %c0_21, %c0_22], %45 {strides = array<i32>} : memref<100x2x32xf32, #tpu.memory_space<vmem>>, vector<1x2x32xf32>,
      %cst_23 = arith.constant dense<0xFF800000> : vector<2xf32>
      %48 = vector.multi_reduction <maximumf>, %44, %cst_23 [1] : vector<2x32xf32> to vector<2xf32>
      %49 = vector.shape_cast %48 : vector<2xf32> to vector<2x1xf32>
      %50 = vector.broadcast %49 : vector<2x1xf32> to vector<2x32xf32>
      %51 = arith.cmpf oeq, %44, %50 : vector<2x32xf32>
      %c32_i32 = arith.constant 32 : i32
      %52 = vector.broadcast %c32_i32 : i32 to vector<2x32xi32>
      %53 = arith.select %51, %6, %52 : vector<2x32xi1>, vector<2x32xi32>
      %cst_24 = arith.constant dense<2147483647> : vector<2xi32>
      %54 = vector.multi_reduction <minsi>, %53, %cst_24 [1] : vector<2x32xi32> to vector<2xi32>
      %55 = vector.shape_cast %54 : vector<2xi32> to vector<2x1xi32>
      %56 = vector.broadcast %55 : vector<2x1xi32> to vector<2x32xi32>
      %57 = arith.cmpi eq, %6, %56 : vector<2x32xi32>
      %cst_25 = arith.constant 1.000000e+00 : f32
      %cst_26 = arith.constant 0.000000e+00 : f32
      %58 = vector.broadcast %cst_25 : f32 to vector<2x32xf32>
      %59 = vector.broadcast %cst_26 : f32 to vector<2x32xf32>
      %60 = arith.select %57, %58, %59 : vector<2x32xi1>, vector<2x32xf32>
      %c1_i32_27 = arith.constant 1 : i32
      %61 = arith.addi %16, %c1_i32_27 : i32
      %cst_28 = arith.constant dense<0.000000e+00> : vector<2x96xf32>
      %62 = tpu.matmul %60, %0, %cst_28 {dimension_numbers = #tpu.dot_dimension_numbers<[1], [0], [0], [1], [0, 0, 1, 1], [], []>} : vector<2x32xf32>, vector<32x96xf32>, vector<2x96xf32> -> vector<2x96xf32>
      %cst_29 = arith.constant dense<0.000000e+00> : vector<2x96xf32>
      %63 = tpu.matmul %41, %1, %cst_29 {dimension_numbers = #tpu.dot_dimension_numbers<[1], [0], [0], [1], [0, 0, 1, 1], [], []>} : vector<2x32xf32>, vector<32x96xf32>, vector<2x96xf32> -> vector<2x96xf32>
      %64 = vector.extract_strided_slice %62 {offsets = [0, 0], sizes = [2, 64], strides = [1, 1]} : vector<2x96xf32> to vector<2x64xf32>
      %65 = vector.extract_strided_slice %63 {offsets = [0, 0], sizes = [2, 64], strides = [1, 1]} : vector<2x96xf32> to vector<2x64xf32>
      %66 = arith.addf %64, %65 : vector<2x64xf32>
      %67 = arith.negf %66 : vector<2x64xf32>
      %68 = math.exp %67 : vector<2x64xf32>
      %cst_30 = arith.constant 1.000000e+00 : f32
      %69 = vector.broadcast %cst_30 : f32 to vector<2x64xf32>
      %70 = arith.addf %69, %68 : vector<2x64xf32>
      %71 = arith.divf %69, %70 : vector<2x64xf32>
      %72 = vector.extract_strided_slice %71 {offsets = [0, 0], sizes = [2, 32], strides = [1, 1]} : vector<2x64xf32> to vector<2x32xf32>
      %73 = vector.extract_strided_slice %71 {offsets = [0, 32], sizes = [2, 32], strides = [1, 1]} : vector<2x64xf32> to vector<2x32xf32>
      %74 = vector.extract_strided_slice %62 {offsets = [0, 64], sizes = [2, 32], strides = [1, 1]} : vector<2x96xf32> to vector<2x32xf32>
      %75 = vector.extract_strided_slice %63 {offsets = [0, 64], sizes = [2, 32], strides = [1, 1]} : vector<2x96xf32> to vector<2x32xf32>
      %76 = vector.broadcast %2 : vector<1x32xf32> to vector<2x32xf32>
      %77 = arith.addf %75, %76 : vector<2x32xf32>
      %78 = arith.mulf %72, %77 : vector<2x32xf32>
      %79 = arith.addf %74, %78 : vector<2x32xf32>
      %80 = math.tanh %79 : vector<2x32xf32>
      %cst_31 = arith.constant 1.000000e+00 : f32
      %81 = vector.broadcast %cst_31 : f32 to vector<2x32xf32>
      %82 = arith.subf %81, %73 : vector<2x32xf32>
      %83 = arith.mulf %82, %80 : vector<2x32xf32>
      %84 = arith.mulf %73, %41 : vector<2x32xf32>
      %85 = arith.addf %83, %84 : vector<2x32xf32>
      %cst_32 = arith.constant dense<0.000000e+00> : vector<2x32xf32>
      %86 = tpu.matmul %85, %3, %cst_32 {dimension_numbers = #tpu.dot_dimension_numbers<[1], [0], [0], [1], [0, 0, 1, 1], [], []>} : vector<2x32xf32>, vector<32x32xf32>, vector<2x32xf32> -> vector<2x32xf32>
      %87 = vector.broadcast %4 : vector<1x32xf32> to vector<2x32xf32>
      %88 = arith.addf %86, %87 : vector<2x32xf32>
      %89 = vector.shape_cast %88 : vector<2x32xf32> to vector<1x2x32xf32>
      %90 = arith.index_cast %61 : i32 to index
      %c0_33 = arith.constant 0 : index
      %c0_34 = arith.constant 0 : index
      %91 = vector.load %arg6[%90, %c0_33, %c0_34] : memref<100x2x32xf32, #tpu.memory_space<vmem>>, vector<1x2x32xf32>
      tpu.vector_store %arg6[%90, %c0_33, %c0_34], %89 {strides = array<i32>} : memref<100x2x32xf32, #tpu.memory_space<vmem>>, vector<1x2x32xf32>,
      %cst_35 = arith.constant dense<0xFF800000> : vector<2xf32>
      %92 = vector.multi_reduction <maximumf>, %88, %cst_35 [1] : vector<2x32xf32> to vector<2xf32>
      %93 = vector.shape_cast %92 : vector<2xf32> to vector<2x1xf32>
      %94 = vector.broadcast %93 : vector<2x1xf32> to vector<2x32xf32>
      %95 = arith.cmpf oeq, %88, %94 : vector<2x32xf32>
      %c32_i32_36 = arith.constant 32 : i32
      %96 = vector.broadcast %c32_i32_36 : i32 to vector<2x32xi32>
      %97 = arith.select %95, %6, %96 : vector<2x32xi1>, vector<2x32xi32>
      %cst_37 = arith.constant dense<2147483647> : vector<2xi32>
      %98 = vector.multi_reduction <minsi>, %97, %cst_37 [1] : vector<2x32xi32> to vector<2xi32>
      %99 = vector.shape_cast %98 : vector<2xi32> to vector<2x1xi32>
      %100 = vector.broadcast %99 : vector<2x1xi32> to vector<2x32xi32>
      %101 = arith.cmpi eq, %6, %100 : vector<2x32xi32>
      %cst_38 = arith.constant 1.000000e+00 : f32
      %cst_39 = arith.constant 0.000000e+00 : f32
      %102 = vector.broadcast %cst_38 : f32 to vector<2x32xf32>
      %103 = vector.broadcast %cst_39 : f32 to vector<2x32xf32>
      %104 = arith.select %101, %102, %103 : vector<2x32xi1>, vector<2x32xf32>
      %c2_i32_40 = arith.constant 2 : i32
      %105 = arith.addi %16, %c2_i32_40 : i32
      %cst_41 = arith.constant dense<0.000000e+00> : vector<2x96xf32>
      %106 = tpu.matmul %104, %0, %cst_41 {dimension_numbers = #tpu.dot_dimension_numbers<[1], [0], [0], [1], [0, 0, 1, 1], [], []>} : vector<2x32xf32>, vector<32x96xf32>, vector<2x96xf32> -> vector<2x96xf32>
      %cst_42 = arith.constant dense<0.000000e+00> : vector<2x96xf32>
      %107 = tpu.matmul %85, %1, %cst_42 {dimension_numbers = #tpu.dot_dimension_numbers<[1], [0], [0], [1], [0, 0, 1, 1], [], []>} : vector<2x32xf32>, vector<32x96xf32>, vector<2x96xf32> -> vector<2x96xf32>
      %108 = vector.extract_strided_slice %106 {offsets = [0, 0], sizes = [2, 64], strides = [1, 1]} : vector<2x96xf32> to vector<2x64xf32>
      %109 = vector.extract_strided_slice %107 {offsets = [0, 0], sizes = [2, 64], strides = [1, 1]} : vector<2x96xf32> to vector<2x64xf32>
      %110 = arith.addf %108, %109 : vector<2x64xf32>
      %111 = arith.negf %110 : vector<2x64xf32>
      %112 = math.exp %111 : vector<2x64xf32>
      %cst_43 = arith.constant 1.000000e+00 : f32
      %113 = vector.broadcast %cst_43 : f32 to vector<2x64xf32>
      %114 = arith.addf %113, %112 : vector<2x64xf32>
      %115 = arith.divf %113, %114 : vector<2x64xf32>
      %116 = vector.extract_strided_slice %115 {offsets = [0, 0], sizes = [2, 32], strides = [1, 1]} : vector<2x64xf32> to vector<2x32xf32>
      %117 = vector.extract_strided_slice %115 {offsets = [0, 32], sizes = [2, 32], strides = [1, 1]} : vector<2x64xf32> to vector<2x32xf32>
      %118 = vector.extract_strided_slice %106 {offsets = [0, 64], sizes = [2, 32], strides = [1, 1]} : vector<2x96xf32> to vector<2x32xf32>
      %119 = vector.extract_strided_slice %107 {offsets = [0, 64], sizes = [2, 32], strides = [1, 1]} : vector<2x96xf32> to vector<2x32xf32>
      %120 = vector.broadcast %2 : vector<1x32xf32> to vector<2x32xf32>
      %121 = arith.addf %119, %120 : vector<2x32xf32>
      %122 = arith.mulf %116, %121 : vector<2x32xf32>
      %123 = arith.addf %118, %122 : vector<2x32xf32>
      %124 = math.tanh %123 : vector<2x32xf32>
      %cst_44 = arith.constant 1.000000e+00 : f32
      %125 = vector.broadcast %cst_44 : f32 to vector<2x32xf32>
      %126 = arith.subf %125, %117 : vector<2x32xf32>
      %127 = arith.mulf %126, %124 : vector<2x32xf32>
      %128 = arith.mulf %117, %85 : vector<2x32xf32>
      %129 = arith.addf %127, %128 : vector<2x32xf32>
      %cst_45 = arith.constant dense<0.000000e+00> : vector<2x32xf32>
      %130 = tpu.matmul %129, %3, %cst_45 {dimension_numbers = #tpu.dot_dimension_numbers<[1], [0], [0], [1], [0, 0, 1, 1], [], []>} : vector<2x32xf32>, vector<32x32xf32>, vector<2x32xf32> -> vector<2x32xf32>
      %131 = vector.broadcast %4 : vector<1x32xf32> to vector<2x32xf32>
      %132 = arith.addf %130, %131 : vector<2x32xf32>
      %133 = vector.shape_cast %132 : vector<2x32xf32> to vector<1x2x32xf32>
      %134 = arith.index_cast %105 : i32 to index
      %c0_46 = arith.constant 0 : index
      %c0_47 = arith.constant 0 : index
      %135 = vector.load %arg6[%134, %c0_46, %c0_47] : memref<100x2x32xf32, #tpu.memory_space<vmem>>, vector<1x2x32xf32>
      tpu.vector_store %arg6[%134, %c0_46, %c0_47], %133 {strides = array<i32>} : memref<100x2x32xf32, #tpu.memory_space<vmem>>, vector<1x2x32xf32>,
      %cst_48 = arith.constant dense<0xFF800000> : vector<2xf32>
      %136 = vector.multi_reduction <maximumf>, %132, %cst_48 [1] : vector<2x32xf32> to vector<2xf32>
      %137 = vector.shape_cast %136 : vector<2xf32> to vector<2x1xf32>
      %138 = vector.broadcast %137 : vector<2x1xf32> to vector<2x32xf32>
      %139 = arith.cmpf oeq, %132, %138 : vector<2x32xf32>
      %c32_i32_49 = arith.constant 32 : i32
      %140 = vector.broadcast %c32_i32_49 : i32 to vector<2x32xi32>
      %141 = arith.select %139, %6, %140 : vector<2x32xi1>, vector<2x32xi32>
      %cst_50 = arith.constant dense<2147483647> : vector<2xi32>
      %142 = vector.multi_reduction <minsi>, %141, %cst_50 [1] : vector<2x32xi32> to vector<2xi32>
      %143 = vector.shape_cast %142 : vector<2xi32> to vector<2x1xi32>
      %144 = vector.broadcast %143 : vector<2x1xi32> to vector<2x32xi32>
      %145 = arith.cmpi eq, %6, %144 : vector<2x32xi32>
      %cst_51 = arith.constant 1.000000e+00 : f32
      %cst_52 = arith.constant 0.000000e+00 : f32
      %146 = vector.broadcast %cst_51 : f32 to vector<2x32xf32>
      %147 = vector.broadcast %cst_52 : f32 to vector<2x32xf32>
      %148 = arith.select %145, %146, %147 : vector<2x32xi1>, vector<2x32xf32>
      %c3_i32 = arith.constant 3 : i32
      %149 = arith.addi %16, %c3_i32 : i32
      %cst_53 = arith.constant dense<0.000000e+00> : vector<2x96xf32>
      %150 = tpu.matmul %148, %0, %cst_53 {dimension_numbers = #tpu.dot_dimension_numbers<[1], [0], [0], [1], [0, 0, 1, 1], [], []>} : vector<2x32xf32>, vector<32x96xf32>, vector<2x96xf32> -> vector<2x96xf32>
      %cst_54 = arith.constant dense<0.000000e+00> : vector<2x96xf32>
      %151 = tpu.matmul %129, %1, %cst_54 {dimension_numbers = #tpu.dot_dimension_numbers<[1], [0], [0], [1], [0, 0, 1, 1], [], []>} : vector<2x32xf32>, vector<32x96xf32>, vector<2x96xf32> -> vector<2x96xf32>
      %152 = vector.extract_strided_slice %150 {offsets = [0, 0], sizes = [2, 64], strides = [1, 1]} : vector<2x96xf32> to vector<2x64xf32>
      %153 = vector.extract_strided_slice %151 {offsets = [0, 0], sizes = [2, 64], strides = [1, 1]} : vector<2x96xf32> to vector<2x64xf32>
      %154 = arith.addf %152, %153 : vector<2x64xf32>
      %155 = arith.negf %154 : vector<2x64xf32>
      %156 = math.exp %155 : vector<2x64xf32>
      %cst_55 = arith.constant 1.000000e+00 : f32
      %157 = vector.broadcast %cst_55 : f32 to vector<2x64xf32>
      %158 = arith.addf %157, %156 : vector<2x64xf32>
      %159 = arith.divf %157, %158 : vector<2x64xf32>
      %160 = vector.extract_strided_slice %159 {offsets = [0, 0], sizes = [2, 32], strides = [1, 1]} : vector<2x64xf32> to vector<2x32xf32>
      %161 = vector.extract_strided_slice %159 {offsets = [0, 32], sizes = [2, 32], strides = [1, 1]} : vector<2x64xf32> to vector<2x32xf32>
      %162 = vector.extract_strided_slice %150 {offsets = [0, 64], sizes = [2, 32], strides = [1, 1]} : vector<2x96xf32> to vector<2x32xf32>
      %163 = vector.extract_strided_slice %151 {offsets = [0, 64], sizes = [2, 32], strides = [1, 1]} : vector<2x96xf32> to vector<2x32xf32>
      %164 = vector.broadcast %2 : vector<1x32xf32> to vector<2x32xf32>
      %165 = arith.addf %163, %164 : vector<2x32xf32>
      %166 = arith.mulf %160, %165 : vector<2x32xf32>
      %167 = arith.addf %162, %166 : vector<2x32xf32>
      %168 = math.tanh %167 : vector<2x32xf32>
      %cst_56 = arith.constant 1.000000e+00 : f32
      %169 = vector.broadcast %cst_56 : f32 to vector<2x32xf32>
      %170 = arith.subf %169, %161 : vector<2x32xf32>
      %171 = arith.mulf %170, %168 : vector<2x32xf32>
      %172 = arith.mulf %161, %129 : vector<2x32xf32>
      %173 = arith.addf %171, %172 : vector<2x32xf32>
      %cst_57 = arith.constant dense<0.000000e+00> : vector<2x32xf32>
      %174 = tpu.matmul %173, %3, %cst_57 {dimension_numbers = #tpu.dot_dimension_numbers<[1], [0], [0], [1], [0, 0, 1, 1], [], []>} : vector<2x32xf32>, vector<32x32xf32>, vector<2x32xf32> -> vector<2x32xf32>
      %175 = vector.broadcast %4 : vector<1x32xf32> to vector<2x32xf32>
      %176 = arith.addf %174, %175 : vector<2x32xf32>
      %177 = vector.shape_cast %176 : vector<2x32xf32> to vector<1x2x32xf32>
      %178 = arith.index_cast %149 : i32 to index
      %c0_58 = arith.constant 0 : index
      %c0_59 = arith.constant 0 : index
      %179 = vector.load %arg6[%178, %c0_58, %c0_59] : memref<100x2x32xf32, #tpu.memory_space<vmem>>, vector<1x2x32xf32>
      tpu.vector_store %arg6[%178, %c0_58, %c0_59], %177 {strides = array<i32>} : memref<100x2x32xf32, #tpu.memory_space<vmem>>, vector<1x2x32xf32>,
      %cst_60 = arith.constant dense<0xFF800000> : vector<2xf32>
      %180 = vector.multi_reduction <maximumf>, %176, %cst_60 [1] : vector<2x32xf32> to vector<2xf32>
      %181 = vector.shape_cast %180 : vector<2xf32> to vector<2x1xf32>
      %182 = vector.broadcast %181 : vector<2x1xf32> to vector<2x32xf32>
      %183 = arith.cmpf oeq, %176, %182 : vector<2x32xf32>
      %c32_i32_61 = arith.constant 32 : i32
      %184 = vector.broadcast %c32_i32_61 : i32 to vector<2x32xi32>
      %185 = arith.select %183, %6, %184 : vector<2x32xi1>, vector<2x32xi32>
      %cst_62 = arith.constant dense<2147483647> : vector<2xi32>
      %186 = vector.multi_reduction <minsi>, %185, %cst_62 [1] : vector<2x32xi32> to vector<2xi32>
      %187 = vector.shape_cast %186 : vector<2xi32> to vector<2x1xi32>
      %188 = vector.broadcast %187 : vector<2x1xi32> to vector<2x32xi32>
      %189 = arith.cmpi eq, %6, %188 : vector<2x32xi32>
      %cst_63 = arith.constant 1.000000e+00 : f32
      %cst_64 = arith.constant 0.000000e+00 : f32
      %190 = vector.broadcast %cst_63 : f32 to vector<2x32xf32>
      %191 = vector.broadcast %cst_64 : f32 to vector<2x32xf32>
      %192 = arith.select %189, %190, %191 : vector<2x32xi1>, vector<2x32xf32>
      scf.yield %173, %192 : vector<2x32xf32>, vector<2x32xf32>
    }
    %c25_i32_12 = arith.constant 25 : i32
    %c0_13 = arith.constant 0 : index
    %c0_14 = arith.constant 0 : index
    %14 = vector.load %arg7[%c0_13, %c0_14] : memref<2x32xf32, #tpu.memory_space<vmem>>, vector<2x32xf32>
    tpu.vector_store %arg7[%c0_13, %c0_14], %13#0 {strides = array<i32>} : memref<2x32xf32, #tpu.memory_space<vmem>>, vector<2x32xf32>,
    return
  }
}

</mosaic_0001>

<bundles_post_ra>
// kernel: decoder_forward.1
= control target key start
LH: loop header
LB: loop body
LE: loop exit
PB: predicated region body
PF: predicated region fallthrough
CT: control target
= control target key end

     0   :  { %13 = vsyncpa [#allocation3], 0  ;;  %v41_v2 = vlaneseq  ;;  %v1531_v17 = vmov 0.0   ;;  %s1658_s28 = smov 0   ;;  %s1882_s0 = inlined_call_operand.vmem [shape: f32[32,96], index: 0, kind: input, shape index: {}]   ;;  %s1883_s1 = inlined_call_operand.vmem [shape: f32[32,96], index: 1, kind: input, shape index: {}]   ;;  %s1884_s2 = inlined_call_operand.vmem [shape: f32[1,32], index: 2, kind: input, shape index: {}]   ;;  %s1885_s3 = inlined_call_operand.vmem [shape: f32[32,32], index: 3, kind: input, shape index: {}]   ;;  %s1886_s4 = inlined_call_operand.vmem [shape: f32[1,32], index: 4, kind: input, shape index: {}]   ;;  %s1887_s5 = inlined_call_operand.vmem [shape: f32[2,32], index: 5, kind: input, shape index: {}]   ;;  %s1888_s6 = inlined_call_operand.vmem [shape: f32[100,2,32], index: 6, kind: output, shape index: {0}]   ;;  %s1889_s7 = inlined_call_operand.hbm [shape: f32[2,32], index: 7, kind: output, shape index: {1}]  }
   0x1   :  { %v1581_v0 = vld [vmem:[%s1882_s0] sm:$0xff]  ;;  %v1586_v1 = vld [vmem:[%s1882_s0 + $0x8] sm:$0xff]  ;;  %v1591_v3 = vld [vmem:[%s1882_s0 + $0x10] sm:$0xff] }
   0x2   :  { %v1596_v4 = vld [vmem:[%s1882_s0 + $0x18] sm:$0xff]  ;;  %v1601_v5 = vld [vmem:[%s1883_s1] sm:$0xff]  ;;  %v1606_v6 = vld [vmem:[%s1883_s1 + $0x8] sm:$0xff]  ;;  %v1618_v9 = vand.u32 127, %v41_v2 }
   0x3   :  { %v1611_v7 = vld [vmem:[%s1883_s1 + $0x10] sm:$0xff]  ;;  %v1616_v8 = vld [vmem:[%s1883_s1 + $0x18] sm:$0xff]  ;;  %v1623_v10 = vld [vmem:[%s1884_s2] ss:$0 sm:$0xff] }
   0x4   :  { %v1628_v11 = vld [vmem:[%s1885_s3] sm:$0xff]  ;;  %v1633_v12 = vld [vmem:[%s1885_s3 + $0x8] sm:$0xff]  ;;  %v1638_v13 = vld [vmem:[%s1885_s3 + $0x10] sm:$0xff]  ;;  %vm43_vm0 = vcmp.eq.s32.totalorder %v1618_v9, 2 }
   0x5   :  { %v1643_v14 = vld [vmem:[%s1885_s3 + $0x18] sm:$0xff]  ;;  %v1648_v15 = vld [vmem:[%s1886_s4] ss:$0 sm:$0xff]  ;;  %v44_v18 = vsel %vm43_vm0, 1.0, %v1531_v17  }
   0x6   :  { %v40_v16 = vld [vmem:[%s1887_s5] sm:$0x3]  }
   0x7 LB: > { %v1532_v19 = vmov 0.0   ;;  %vm54_vm1 = vcmask 261120   ;;  %vm1533_vm2 = vmmov 0   ;;  %s1534_s3 = smov 64   ;;  %s1535_s4 = smov 32   ;;  %vm322_vm3 = vcmask 254976   ;;  %s1529_s28 = sphi %s1658_s28, %s50_s28   ;;  %v1525_v16 = vphi %v40_v16, %v1890_v16   ;;  %v1521_v18 = vphi %v44_v18, %v1158_v18  }
   0x8   : > { %1298 = vmatprep.subr.mxu0 %v1532_v19  ;;  %1309 = vmatprep.subr.mxu1 %v1532_v19  ;;  %s1536_s5 = smov 96   ;;  %s1234_s29 = sshll.u32 %s1529_s28, 3 }
   0x9   : > { %1299 = vmatpush3.msra.mxu0 %v1596_v4  ;;  %1310 = vmatpush3.msra.mxu1 %v1616_v8  ;;  %s1747_s9 = scalar_lea.vmem %s1888_s6, %s1234_s29  ;;  %s50_s28 = sadd.s32 1, %s1529_s28  }
   0xa   : > { %1300 = vmatprep.subr.mxu0 %v1532_v19  ;;  %1311 = vmatprep.subr.mxu1 %v1532_v19  ;;  %p47_p0 = scmp.ge.s32.totalorder %s50_s28, 25  }
   0xb   : > { %1301 = vmatpush3.msra.mxu0 %v1591_v3  ;;  %1312 = vmatpush3.msra.mxu1 %v1611_v7  ;;  %s1537_s10 = smov (%p47_p0), [#allocation2]  }
   0xc   : > { %1302 = vmatprep.subr.mxu0 %v1532_v19  ;;  %1313 = vmatprep.subr.mxu1 %v1532_v19  ;;  %s1170_s11 = sshll.u32 (%p47_p0), %s1537_s10, 4  ;;  %s1171_s11 = int_to_ptr.vmem [resolvable:$true] %s1170_s11 }
   0xd   : > { %1303 = vmatpush3.msra.mxu0 %v1586_v1  ;;  %1314 = vmatpush3.msra.mxu1 %v1606_v6  ;;  %s1485_s12 = scalar_lea.vmem (%p47_p0), %s1171_s11, 32  ;;  %p1490_p2 = scmp.lt.s32.totalorder (%p47_p0), %s1171_s11, %s1171_s11 }
   0xe   : > { %1304 = vmatprep.subr.mxu0 %v1532_v19  ;;  %1315 = vmatprep.subr.mxu1 %v1532_v19  ;;  %p1486_p1 = scmp.ne.s32.totalorder (%p47_p0), %s1171_s11, %s1485_s12  ;;  %p1491_p3 = scmp.lt.s32.totalorder (%p47_p0), %s1485_s12, %s1485_s12 }
   0xf   : > { %1305 = vmatpush3.msra.mxu0 %v1581_v0  ;;  %1306 = vmatprep.mubr.msk.f32.mxu0 %vm1533_vm2, %v1532_v19 }
  0x10   : > { %1316 = vmatpush3.msra.mxu1 %v1601_v5  ;;  %1317 = vmatprep.mubr.msk.f32.mxu1 %vm1533_vm2, %v1532_v19  ;;  %p1492_p4 = por (%p47_p0), %p1491_p3, %p1490_p2 }
  0x11   : > { %1307 = vmatmul.mubr.msk.f32.vlgmr.msra.gmra.mxu0 %vm54_vm1, %v1521_v18  ;;  %1318 = vmatmul.mubr.msk.f32.vlgmr.msra.gmra.mxu1 %vm54_vm1, %v1525_v16 }
  0x12   : > { %213 = vrot.lane.b32.xlu0 %v1623_v10, %s1534_s3  ;;  %1320 = vmatprep.subr.mxu0 %v1532_v19  ;;  %p1493_p5 = pnand (%p47_p0), %p1492_p4, %p1486_p1 }
  0x13   : > { %1321 = vmatpush3.msra.mxu0 %v1643_v14  ;;  %1328 = vmatprep.mubr.msk.f32.mxu0 %vm1533_vm2, %v1532_v19 }
  0x14   : > { %1322 = vmatprep.subr.mxu0 %v1532_v19  ;;  %1331 = vmatprep.subr.mxu1 %v1532_v19 }
  0x15   : > { %1323 = vmatpush3.msra.mxu0 %v1638_v13  ;;  %1332 = vmatpush3.msra.mxu1 %v1596_v4 }
  0x16   : > { %1324 = vmatprep.subr.mxu0 %v1532_v19  ;;  %1333 = vmatprep.subr.mxu1 %v1532_v19 }
  0x17   : > { %1325 = vmatpush3.msra.mxu0 %v1633_v12  ;;  %1334 = vmatpush3.msra.mxu1 %v1591_v3 }
  0x18   : > { %1326 = vmatprep.subr.mxu0 %v1532_v19  ;;  %1335 = vmatprep.subr.mxu1 %v1532_v19 }
  0x19   : > { %1327 = vmatpush3.msra.mxu0 %v1628_v11  ;;  %1336 = vmatpush3.msra.mxu1 %v1586_v1 }
  0x1a   : > { %1342 = vmatprep.subr.mxu0 %v1532_v19  ;;  %1337 = vmatprep.subr.mxu1 %v1532_v19 }
  0x1b   : > { %1338 = vmatpush3.msra.mxu1 %v1581_v0  ;;  %1339 = vmatprep.mubr.msk.f32.mxu1 %vm1533_vm2, %v1532_v19 }
  0x1c   : > { %1353 = vmatprep.subr.mxu1 %v1532_v19 }
  0x84   : > { %v1711_v20 = vpop.permute.xlu0 %213 }
  0xd1   : > { %v124_v21 = vpop.f32.mrf.mxu0  ;;  %v197_v22 = vpop.f32.mrf.mxu1 }
  0xd2   : > { %v216_v23 = vadd.f32 %v1711_v20, %v197_v22  ;;  %v201_v26 = vadd.f32 %v197_v22, %v124_v21 }
  0xd3   : > { %v1319_v24 = vpop.f32.mrf.mxu1  ;;  %v1308_v25 = vpop.f32.mrf.mxu0 }
  0xd4   : > { %218 = vrot.lane.b32.xlu0 %v216_v23, %s1534_s3  ;;  %v1208_v27 = vmul.f32 -1.442695, %v201_v26 }
  0xd6   : > { %1461 = vpow2.f32 %v1208_v27 }
  0xd8   : > { %234 = vrot.lane.b32.xlu0 %v1525_v16, %s1535_s4 }
  0xe3   : > { %v1462_v28 = vpop.eup %1461 }
  0xe4   : > { %v205_v29 = vadd.f32 1.0, %v1462_v28 }
  0xe6   : > { %1463 = vrcp.f32 %v205_v29 }
  0xf3   : > { %v1464_v30 = vpop.eup %1463 }
  0xf4   : > { %v228_v37 = vsub.f32 1.0, %v1464_v30 }
 0x146   : > { %v219_v31 = vpop.permute.xlu0 %218 }
 0x147   : > { %v221_v32 = vmul.f32 %v1464_v30, %v219_v31 }
 0x149   : > { %223 = vrot.lane.b32.xlu1 %v221_v32, %s1534_s3 }
 0x14a   : > { %v235_v36 = vpop.permute.xlu0 %234 }
 0x14b   : > { %v237_v39 = vmul.f32 %v1464_v30, %v235_v36 }
 0x1bb   : > { %v224_v33 = vpop.permute.xlu1 %223 }
 0x1bc   : > { %v226_v34 = vadd.f32 %v224_v33, %v124_v21 }
 0x1be   : > { %1465 = vtanh.f32 %v226_v34 }
 0x1cb   : > { %v1466_v35 = vpop.eup %1465 }
 0x1cc   : > { %230 = vrot.lane.b32.xlu1 %v1466_v35, %s1536_s5 }
 0x23e   : > { %v231_v38 = vpop.permute.xlu1 %230 }
 0x23f   : > { %v233_v40 = vmul.f32 %v231_v38, %v228_v37 }
 0x241   : > { %v1717_v41 = vadd.f32 %v237_v39, %v233_v40 }
 0x243   : > { %246 = vrot.lane.b32.xlu1 %v1717_v41, %s1536_s5 }
 0x2b5   : > { %v247_v42 = vpop.permute.xlu1 %246 }
 0x2b6   : > { %1329 = vmatmul.mubr.msk.f32.vlgmr.msra.gmra.mxu0 %vm54_vm1, %v247_v42 }
 0x2b7   : > { %1343 = vmatpush3.msra.mxu0 %v1616_v8  ;;  %1350 = vmatprep.mubr.msk.f32.mxu0 %vm1533_vm2, %v1532_v19 }
 0x2b8   : > { %1344 = vmatprep.subr.mxu0 %v1532_v19 }
 0x2b9   : > { %1345 = vmatpush3.msra.mxu0 %v1611_v7 }
 0x2ba   : > { %1346 = vmatprep.subr.mxu0 %v1532_v19 }
 0x2bb   : > { %1347 = vmatpush3.msra.mxu0 %v1606_v6 }
 0x2bc   : > { %1348 = vmatprep.subr.mxu0 %v1532_v19 }
 0x2bd   : > { %1349 = vmatpush3.msra.mxu0 %v1601_v5 }
 0x2be   : > { %1351 = vmatmul.mubr.msk.f32.vlgmr.msra.gmra.mxu0 %vm54_vm1, %v247_v42  ;;  %1364 = vmatprep.subr.mxu0 %v1532_v19 }
 0x2bf   : > { %1365 = vmatpush3.msra.mxu0 %v1596_v4  ;;  %1372 = vmatprep.mubr.msk.f32.mxu0 %vm1533_vm2, %v1532_v19 }
 0x2c0   : > { %1366 = vmatprep.subr.mxu0 %v1532_v19 }
 0x2c1   : > { %1367 = vmatpush3.msra.mxu0 %v1591_v3 }
 0x2c2   : > { %1368 = vmatprep.subr.mxu0 %v1532_v19 }
 0x2c3   : > { %1369 = vmatpush3.msra.mxu0 %v1586_v1 }
 0x2c4   : > { %1370 = vmatprep.subr.mxu0 %v1532_v19 }
 0x2c5   : > { %1371 = vmatpush3.msra.mxu0 %v1581_v0 }
 0x2c6   : > { %1386 = vmatprep.subr.mxu0 %v1532_v19 }
 0x376   : > { %v316_v43 = vpop.f32.mrf.mxu0 }
 0x377   : > { %v317_v44 = vadd.f32 %v1648_v15, %v316_v43 }
 0x378   : > { %v1330_v45 = vpop.f32.mrf.mxu0 }
 0x379   : > { %323 = vst.msk [vmem:[%s1747_s9] sm:$0x3] %vm322_vm3, %v317_v44  ;;  %v324_v46 = vsel %vm322_vm3, %v317_v44, -inf }
 0x37a   : > { %325 = vmax.xlane.f32.xlu0 %v324_v46 }
 0x37e   : > { %v486_v47 = vpop.f32.mrf.mxu0 }
 0x37f   : > { %v497_v58 = vadd.f32 %v486_v47, %v1711_v20 }
 0x380   : > { %v1352_v48 = vpop.f32.mrf.mxu0 }
 0x403   : > { %v326_v49 = vpop.xlane.xlu0 %325 }
 0x404   : > { %vm327_vm4 = vcmp.eq.f32.partialorder %v317_v44, %v326_v49 }
 0x405   : > { %v328_v50 = vsel %vm327_vm4, %v1618_v9, 32 }
 0x406   : > { %v329_v51 = vsel %vm322_vm3, %v328_v50, 2147483647 }
 0x407   : > { %v331_v52 = vshra.s32 %v329_v51, 16  ;;  %v330_v54 = vand.u32 65535, %v329_v51 }
 0x409   : > { %v333_v53 = vcvt.s32.f32 %v331_v52  ;;  %v332_v56 = vcvt.s32.f32 %v330_v54 }
 0x40b   : > { %334 = vmin.xlane.f32.xlu1 %v333_v53 }
 0x494   : > { %v335_v55 = vpop.xlane.xlu1 %334 }
 0x495   : > { %vm336_vm5 = vcmp.eq.f32.partialorder %v333_v53, %v335_v55  ;;  %v341_v59 = vcvt.f32.s32 %v335_v55 }
 0x496   : > { %v337_v57 = vsel %vm336_vm5, %v332_v56, inf }
 0x497   : > { %338 = vmin.xlane.f32.xlu0 %v337_v57  ;;  %v342_v61 = vshll.u32 %v341_v59, 16 }
 0x4ad   : > { %499 = vrot.lane.b32.xlu0 %v497_v58, %s1534_s3 }
 0x520   : > { %v339_v60 = vpop.xlane.xlu0 %338 }
 0x521   : > { %v340_v62 = vcvt.f32.s32 %v339_v60 }
 0x523   : > { %v343_v63 = vadd.s32 %v342_v61, %v340_v62 }
 0x524   : > { %v500_v25 = vpop.permute.xlu0 %499 }
 0x525   : > { %vm344_vm6 = vcmp.eq.s32.totalorder %v1618_v9, %v343_v63 }
 0x526   : > { %v345_v2 = vsel %vm344_vm6, 1.0, %v1532_v19 }
 0x527   : > { %1340 = vmatmul.mubr.msk.f32.vlgmr.msra.gmra.mxu1 %vm54_vm1, %v345_v2 }
 0x528   : > { %1354 = vmatpush3.msra.mxu1 %v1643_v14  ;;  %1361 = vmatprep.mubr.msk.f32.mxu1 %vm1533_vm2, %v1532_v19 }
 0x529   : > { %1355 = vmatprep.subr.mxu1 %v1532_v19 }
 0x52a   : > { %1356 = vmatpush3.msra.mxu1 %v1638_v13 }
 0x52b   : > { %1357 = vmatprep.subr.mxu1 %v1532_v19 }
 0x52c   : > { %1358 = vmatpush3.msra.mxu1 %v1633_v12 }
 0x52d   : > { %1359 = vmatprep.subr.mxu1 %v1532_v19 }
 0x52e   : > { %1360 = vmatpush3.msra.mxu1 %v1628_v11 }
 0x52f   : > { %1375 = vmatprep.subr.mxu1 %v1532_v19 }
 0x5e7   : > { %v416_v16 = vpop.f32.mrf.mxu1 }
 0x5e8   : > { %v490_v17 = vadd.f32 %v486_v47, %v416_v16 }
 0x5e9   : > { %v1341_v18 = vpop.f32.mrf.mxu1 }
 0x5ea   : > { %v1215_v21 = vmul.f32 -1.442695, %v490_v17 }
 0x5ec   : > { %1467 = vpow2.f32 %v1215_v21 }
 0x5f9   : > { %v1468_v22 = vpop.eup %1467 }
 0x5fa   : > { %v494_v23 = vadd.f32 1.0, %v1468_v22 }
 0x5fc   : > { %1469 = vrcp.f32 %v494_v23 }
 0x609   : > { %v1470_v24 = vpop.eup %1469 }
 0x60a   : > { %v502_v26 = vmul.f32 %v1470_v24, %v500_v25  ;;  %v509_v30 = vsub.f32 1.0, %v1470_v24  ;;  %v515_v32 = vmul.f32 %v1470_v24, %v1717_v41 }
 0x60c   : > { %504 = vrot.lane.b32.xlu1 %v502_v26, %s1534_s3 }
 0x67e   : > { %v505_v27 = vpop.permute.xlu1 %504 }
 0x67f   : > { %v507_v28 = vadd.f32 %v505_v27, %v416_v16 }
 0x681   : > { %1471 = vtanh.f32 %v507_v28 }
 0x68e   : > { %v1472_v29 = vpop.eup %1471 }
 0x68f   : > { %511 = vrot.lane.b32.xlu1 %v1472_v29, %s1536_s5 }
 0x701   : > { %v512_v31 = vpop.permute.xlu1 %511 }
 0x702   : > { %v514_v33 = vmul.f32 %v512_v31, %v509_v30 }
 0x704   : > { %v1773_v34 = vadd.f32 %v515_v32, %v514_v33 }
 0x706   : > { %518 = vrot.lane.b32.xlu0 %v1773_v34, %s1536_s5 }
 0x778   : > { %v519_v35 = vpop.permute.xlu0 %518 }
 0x779   : > { %1362 = vmatmul.mubr.msk.f32.vlgmr.msra.gmra.mxu1 %vm54_vm1, %v519_v35 }
 0x77a   : > { %1376 = vmatpush3.msra.mxu1 %v1616_v8  ;;  %1383 = vmatprep.mubr.msk.f32.mxu1 %vm1533_vm2, %v1532_v19 }
 0x77b   : > { %1377 = vmatprep.subr.mxu1 %v1532_v19 }
 0x77c   : > { %1378 = vmatpush3.msra.mxu1 %v1611_v7 }
 0x77d   : > { %1379 = vmatprep.subr.mxu1 %v1532_v19 }
 0x77e   : > { %1380 = vmatpush3.msra.mxu1 %v1606_v6 }
 0x77f   : > { %1381 = vmatprep.subr.mxu1 %v1532_v19 }
 0x780   : > { %1382 = vmatpush3.msra.mxu1 %v1601_v5 }
 0x781   : > { %1384 = vmatmul.mubr.msk.f32.vlgmr.msra.gmra.mxu1 %vm54_vm1, %v519_v35  ;;  %1397 = vmatprep.subr.mxu1 %v1532_v19 }
 0x782   : > { %1398 = vmatpush3.msra.mxu1 %v1596_v4  ;;  %1405 = vmatprep.mubr.msk.f32.mxu1 %vm1533_vm2, %v1532_v19 }
 0x783   : > { %1399 = vmatprep.subr.mxu1 %v1532_v19 }
 0x784   : > { %1400 = vmatpush3.msra.mxu1 %v1591_v3 }
 0x785   : > { %1401 = vmatprep.subr.mxu1 %v1532_v19 }
 0x786   : > { %1402 = vmatpush3.msra.mxu1 %v1586_v1 }
 0x787   : > { %1403 = vmatprep.subr.mxu1 %v1532_v19 }
 0x788   : > { %1404 = vmatpush3.msra.mxu1 %v1581_v0 }
 0x789   : > { %1419 = vmatprep.subr.mxu1 %v1532_v19 }
 0x839   : > { %v588_v36 = vpop.f32.mrf.mxu1 }
 0x83a   : > { %v589_v37 = vadd.f32 %v1648_v15, %v588_v36 }
 0x83b   : > { %v1363_v38 = vpop.f32.mrf.mxu1 }
 0x83c   : > { %1219 = vst.msk [vmem:[%s1747_s9 + $0x2] sm:$0x3] %vm322_vm3, %v589_v37  ;;  %v595_v39 = vsel %vm322_vm3, %v589_v37, -inf }
 0x83d   : > { %596 = vmax.xlane.f32.xlu1 %v595_v39 }
 0x841   : > { %v757_v40 = vpop.f32.mrf.mxu1 }
 0x842   : > { %v768_v42 = vadd.f32 %v757_v40, %v1711_v20 }
 0x843   : > { %v1385_v41 = vpop.f32.mrf.mxu1 }
 0x84e   : > { %770 = vrot.lane.b32.xlu1 %v768_v42, %s1534_s3 }
 0x8c6   : > { %v597_v43 = vpop.xlane.xlu1 %596 }
 0x8c7   : > { %vm598_vm7 = vcmp.eq.f32.partialorder %v589_v37, %v597_v43 }
 0x8c8   : > { %v599_v44 = vsel %vm598_vm7, %v1618_v9, 32 }
 0x8c9   : > { %v600_v45 = vsel %vm322_vm3, %v599_v44, 2147483647 }
 0x8ca   : > { %v602_v46 = vshra.s32 %v600_v45, 16  ;;  %v601_v48 = vand.u32 65535, %v600_v45  ;;  %v771_v16 = vpop.permute.xlu1 %770 }
 0x8cc   : > { %v604_v47 = vcvt.s32.f32 %v602_v46  ;;  %v603_v50 = vcvt.s32.f32 %v601_v48 }
 0x8ce   : > { %605 = vmin.xlane.f32.xlu0 %v604_v47 }
 0x957   : > { %v606_v49 = vpop.xlane.xlu0 %605 }
 0x958   : > { %vm607_vm8 = vcmp.eq.f32.partialorder %v604_v47, %v606_v49  ;;  %v612_v52 = vcvt.f32.s32 %v606_v49 }
 0x959   : > { %v608_v51 = vsel %vm607_vm8, %v603_v50, inf }
 0x95a   : > { %609 = vmin.xlane.f32.xlu0 %v608_v51  ;;  %v613_v54 = vshll.u32 %v612_v52, 16 }
 0x9e3   : > { %v610_v53 = vpop.xlane.xlu0 %609 }
 0x9e4   : > { %v611_v55 = vcvt.f32.s32 %v610_v53 }
 0x9e6   : > { %v614_v56 = vadd.s32 %v613_v54, %v611_v55 }
 0x9e8   : > { %vm615_vm9 = vcmp.eq.s32.totalorder %v1618_v9, %v614_v56 }
 0x9e9   : > { %v616_v57 = vsel %vm615_vm9, 1.0, %v1532_v19 }
 0x9ea   : > { %1373 = vmatmul.mubr.msk.f32.vlgmr.msra.gmra.mxu0 %vm54_vm1, %v616_v57 }
 0x9eb   : > { %1387 = vmatpush3.msra.mxu0 %v1643_v14  ;;  %1394 = vmatprep.mubr.msk.f32.mxu0 %vm1533_vm2, %v1532_v19 }
 0x9ec   : > { %1388 = vmatprep.subr.mxu0 %v1532_v19 }
 0x9ed   : > { %1389 = vmatpush3.msra.mxu0 %v1638_v13 }
 0x9ee   : > { %1390 = vmatprep.subr.mxu0 %v1532_v19 }
 0x9ef   : > { %1391 = vmatpush3.msra.mxu0 %v1633_v12 }
 0x9f0   : > { %1392 = vmatprep.subr.mxu0 %v1532_v19 }
 0x9f1   : > { %1393 = vmatpush3.msra.mxu0 %v1628_v11 }
 0x9f2   : > { %1408 = vmatprep.subr.mxu0 %v1532_v19 }
 0xaaa   : > { %v687_v58 = vpop.f32.mrf.mxu0 }
 0xaab   : > { %v761_v59 = vadd.f32 %v757_v40, %v687_v58 }
 0xaac   : > { %v1374_v60 = vpop.f32.mrf.mxu0 }
 0xaad   : > { %v1222_v61 = vmul.f32 -1.442695, %v761_v59 }
 0xaaf   : > { %1473 = vpow2.f32 %v1222_v61 }
 0xabc   : > { %v1474_v62 = vpop.eup %1473 }
 0xabd   : > { %v765_v63 = vadd.f32 1.0, %v1474_v62 }
 0xabf   : > { %1475 = vrcp.f32 %v765_v63 }
 0xacc   : > { %v1476_v2 = vpop.eup %1475 }
 0xacd   : > { %v773_v17 = vmul.f32 %v1476_v2, %v771_v16  ;;  %v780_v23 = vsub.f32 1.0, %v1476_v2  ;;  %v786_v25 = vmul.f32 %v1476_v2, %v1773_v34 }
 0xacf   : > { %775 = vrot.lane.b32.xlu0 %v773_v17, %s1534_s3 }
 0xb41   : > { %v776_v18 = vpop.permute.xlu0 %775 }
 0xb42   : > { %v778_v21 = vadd.f32 %v776_v18, %v687_v58 }
 0xb44   : > { %1477 = vtanh.f32 %v778_v21 }
 0xb51   : > { %v1478_v22 = vpop.eup %1477 }
 0xb52   : > { %782 = vrot.lane.b32.xlu1 %v1478_v22, %s1536_s5 }
 0xbc4   : > { %v783_v24 = vpop.permute.xlu1 %782 }
 0xbc5   : > { %v785_v26 = vmul.f32 %v783_v24, %v780_v23 }
 0xbc7   : > { %v1823_v27 = vadd.f32 %v786_v25, %v785_v26 }
 0xbc9   : > { %789 = vrot.lane.b32.xlu1 %v1823_v27, %s1536_s5 }
 0xc3b   : > { %v790_v28 = vpop.permute.xlu1 %789 }
 0xc3c   : > { %1395 = vmatmul.mubr.msk.f32.vlgmr.msra.gmra.mxu0 %vm54_vm1, %v790_v28 }
 0xc3d   : > { %1409 = vmatpush3.msra.mxu0 %v1616_v8  ;;  %1416 = vmatprep.mubr.msk.f32.mxu0 %vm1533_vm2, %v1532_v19 }
 0xc3e   : > { %1410 = vmatprep.subr.mxu0 %v1532_v19 }
 0xc3f   : > { %1411 = vmatpush3.msra.mxu0 %v1611_v7 }
 0xc40   : > { %1412 = vmatprep.subr.mxu0 %v1532_v19 }
 0xc41   : > { %1413 = vmatpush3.msra.mxu0 %v1606_v6 }
 0xc42   : > { %1414 = vmatprep.subr.mxu0 %v1532_v19 }
 0xc43   : > { %1415 = vmatpush3.msra.mxu0 %v1601_v5 }
 0xc44   : > { %1417 = vmatmul.mubr.msk.f32.vlgmr.msra.gmra.mxu0 %vm54_vm1, %v790_v28 }
 0xcfc   : > { %v859_v29 = vpop.f32.mrf.mxu0 }
 0xcfd   : > { %v860_v30 = vadd.f32 %v1648_v15, %v859_v29 }
 0xcfe   : > { %v1396_v31 = vpop.f32.mrf.mxu0 }
 0xcff   : > { %1226 = vst.msk [vmem:[%s1747_s9 + $0x4] sm:$0x3] %vm322_vm3, %v860_v30  ;;  %v866_v32 = vsel %vm322_vm3, %v860_v30, -inf }
 0xd00   : > { %867 = vmax.xlane.f32.xlu0 %v866_v32 }
 0xd04   : > { %v1028_v33 = vpop.f32.mrf.mxu0 }
 0xd05   : > { %v1039_v44 = vadd.f32 %v1028_v33, %v1711_v20 }
 0xd06   : > { %v1418_v34 = vpop.f32.mrf.mxu0 }
 0xd89   : > { %v868_v35 = vpop.xlane.xlu0 %867 }
 0xd8a   : > { %vm869_vm10 = vcmp.eq.f32.partialorder %v860_v30, %v868_v35 }
 0xd8b   : > { %v870_v36 = vsel %vm869_vm10, %v1618_v9, 32 }
 0xd8c   : > { %v871_v37 = vsel %vm322_vm3, %v870_v36, 2147483647 }
 0xd8d   : > { %v873_v38 = vshra.s32 %v871_v37, 16  ;;  %v872_v40 = vand.u32 65535, %v871_v37 }
 0xd8f   : > { %v875_v39 = vcvt.s32.f32 %v873_v38  ;;  %v874_v42 = vcvt.s32.f32 %v872_v40 }
 0xd91   : > { %876 = vmin.xlane.f32.xlu1 %v875_v39 }
 0xe1a   : > { %v877_v41 = vpop.xlane.xlu1 %876 }
 0xe1b   : > { %vm878_vm11 = vcmp.eq.f32.partialorder %v875_v39, %v877_v41  ;;  %v883_v45 = vcvt.f32.s32 %v877_v41 }
 0xe1c   : > { %v879_v43 = vsel %vm878_vm11, %v874_v42, inf }
 0xe1d   : > { %880 = vmin.xlane.f32.xlu0 %v879_v43  ;;  %v884_v47 = vshll.u32 %v883_v45, 16 }
 0xe33   : > { %1041 = vrot.lane.b32.xlu0 %v1039_v44, %s1534_s3 }
 0xea6   : > { %v881_v46 = vpop.xlane.xlu0 %880 }
 0xea7   : > { %v882_v48 = vcvt.f32.s32 %v881_v46 }
 0xea9   : > { %v885_v49 = vadd.s32 %v884_v47, %v882_v48 }
 0xeaa   : > { %v1042_v57 = vpop.permute.xlu0 %1041 }
 0xeab   : > { %vm886_vm12 = vcmp.eq.s32.totalorder %v1618_v9, %v885_v49 }
 0xeac   : > { %v887_v50 = vsel %vm886_vm12, 1.0, %v1532_v19 }
 0xead   : > { %1406 = vmatmul.mubr.msk.f32.vlgmr.msra.gmra.mxu1 %vm54_vm1, %v887_v50 }
 0xeae   : > { %1420 = vmatpush3.msra.mxu1 %v1643_v14  ;;  %1427 = vmatprep.mubr.msk.f32.mxu1 %vm1533_vm2, %v1532_v19 }
 0xeaf   : > { %1421 = vmatprep.subr.mxu1 %v1532_v19 }
 0xeb0   : > { %1422 = vmatpush3.msra.mxu1 %v1638_v13 }
 0xeb1   : > { %1423 = vmatprep.subr.mxu1 %v1532_v19 }
 0xeb2   : > { %1424 = vmatpush3.msra.mxu1 %v1633_v12 }
 0xeb3   : > { %1425 = vmatprep.subr.mxu1 %v1532_v19 }
 0xeb4   : > { %1426 = vmatpush3.msra.mxu1 %v1628_v11 }
 0xf6d   : > { %v958_v20 = vpop.f32.mrf.mxu1 }
 0xf6e   : > { %v1032_v51 = vadd.f32 %v1028_v33, %v958_v20 }
 0xf6f   : > { %v1407_v52 = vpop.f32.mrf.mxu1 }
 0xf70   : > { %v1229_v53 = vmul.f32 -1.442695, %v1032_v51 }
 0xf72   : > { %1479 = vpow2.f32 %v1229_v53 }
 0xf7f   : > { %v1480_v54 = vpop.eup %1479 }
 0xf80   : > { %v1036_v55 = vadd.f32 1.0, %v1480_v54 }
 0xf82   : > { %1481 = vrcp.f32 %v1036_v55 }
 0xf8f   : > { %v1482_v56 = vpop.eup %1481 }
 0xf90   : > { %v1044_v58 = vmul.f32 %v1482_v56, %v1042_v57  ;;  %v1051_v62 = vsub.f32 1.0, %v1482_v56  ;;  %v1057_v2 = vmul.f32 %v1482_v56, %v1823_v27 }
 0xf92   : > { %1046 = vrot.lane.b32.xlu1 %v1044_v58, %s1534_s3 }
0x1004   : > { %v1047_v59 = vpop.permute.xlu1 %1046 }
0x1005   : > { %v1049_v60 = vadd.f32 %v1047_v59, %v958_v20 }
0x1007   : > { %1483 = vtanh.f32 %v1049_v60 }
0x1014   : > { %v1484_v61 = vpop.eup %1483 }
0x1015   : > { %1053 = vrot.lane.b32.xlu1 %v1484_v61, %s1536_s5 }
0x1087   : > { %v1054_v63 = vpop.permute.xlu1 %1053 }
0x1088   : > { %v1056_v16 = vmul.f32 %v1054_v63, %v1051_v62 }
0x108a   : > { %v1058_v17 = vadd.f32 %v1057_v2, %v1056_v16 }
0x108c   : > { %1060 = vrot.lane.b32.xlu0 %v1058_v17, %s1536_s5 }
0x10fe   : > { %v1061_v21 = vpop.permute.xlu0 %1060  }
0x10ff   : > { %1428 = vmatmul.mubr.msk.f32.vlgmr.msra.gmra.mxu1 %vm54_vm1, %v1061_v21  ;;  %v1890_v16 = vmov %v1061_v21  ;;  %1161 = vst.msk [vmem:[#allocation2] sm:$0x3] (%p47_p0), %vm322_vm3, %v1061_v21 }
0x11bf   : > { %v1130_v18 = vpop.f32.mrf.mxu1 }
0x11c0   : > { %v1131_v22 = vadd.f32 %v1648_v15, %v1130_v18 }
0x11c1   : > { %v1429_v23 = vpop.f32.mrf.mxu1 }
0x11c2   : > { %1233 = vst.msk [vmem:[%s1747_s9 + $0x6] sm:$0x3] %vm322_vm3, %v1131_v22  ;;  %v1137_v24 = vsel %vm322_vm3, %v1131_v22, -inf }
0x11c3   : > { %1138 = vmax.xlane.f32.xlu1 %v1137_v24 }
0x124c   : > { %v1139_v25 = vpop.xlane.xlu1 %1138 }
0x124d   : > { %vm1140_vm13 = vcmp.eq.f32.partialorder %v1131_v22, %v1139_v25 }
0x124e   : > { %v1141_v26 = vsel %vm1140_vm13, %v1618_v9, 32 }
0x124f   : > { %v1142_v27 = vsel %vm322_vm3, %v1141_v26, 2147483647 }
0x1250   : > { %v1144_v28 = vshra.s32 %v1142_v27, 16  ;;  %v1143_v30 = vand.u32 65535, %v1142_v27 }
0x1252   : > { %v1146_v29 = vcvt.s32.f32 %v1144_v28  ;;  %v1145_v32 = vcvt.s32.f32 %v1143_v30 }
0x1254   : > { %1147 = vmin.xlane.f32.xlu0 %v1146_v29 }
0x12dd   : > { %v1148_v31 = vpop.xlane.xlu0 %1147 }
0x12de   : > { %vm1149_vm14 = vcmp.eq.f32.partialorder %v1146_v29, %v1148_v31  ;;  %v1154_v34 = vcvt.f32.s32 %v1148_v31 }
0x12df   : > { %v1150_v33 = vsel %vm1149_vm14, %v1145_v32, inf }
0x12e0   : > { %1151 = vmin.xlane.f32.xlu0 %v1150_v33  ;;  %v1155_v36 = vshll.u32 %v1154_v34, 16 }
0x1369   : > { %v1152_v35 = vpop.xlane.xlu0 %1151 }
0x136a   : > { %v1153_v37 = vcvt.f32.s32 %v1152_v35 }
0x136b   :  { %49 = sbr.rel (!%p47_p0) target bundleno = 7 (0x7), region = 63 }
0x136c   : > { %v1156_v38 = vadd.s32 %v1155_v36, %v1153_v37 }
0x136e   : > { %vm1157_vm15 = vcmp.eq.s32.totalorder %v1618_v9, %v1156_v38 }
0x136f   : > { %v1158_v18 = vsel %vm1157_vm15, 1.0, %v1532_v19  }
0x1370   :  { %1496 = shalt.err (!%p1493_p5)
}
0x1371   :  { %1173 = dma.vmem_to_hbm [thread:$0]  %s1171_s11, 32, %s1889_s7, [#allocation3]  }
0x1372   :  { %1517 = dma.done.wait [#allocation3], 32  }
0x1373   :  { %1518 = vsyncadd [#allocation3], 4294967264 }
0x1374   :  { %1179 = vsyncpa [#allocation3], 1 }

</bundles_post_ra>
